<compile_context>
chip_gen: v5e
topology: v5e:2x2
jax: 0.10.0
libtpu: 0.0.40
codegen_flags: <defaults>
</compile_context>

<pallas_src>
import functools

import jax
import jax.numpy as jnp
from jax import lax
from jax.experimental import pallas as pl
from jax.experimental.pallas import tpu as pltpu

_LANES = 128
_SUBLANES = 8
_CHUNK_ROWS = 256                        # rows per in-kernel sub-chunk
_TARGET_BLOCK_BYTES = 4 * 1024 * 1024    # ~4 MiB per input per grid step
_VMEM_LIMIT_BYTES = 32 * 1024 * 1024     # 2 in x 2 buf x 4 MiB + headroom


def _tensorcores_per_device() -> int:
    """Best-effort TensorCores per device: 2 on v7x, 1 on v5e/v6e/unknown."""
    try:
        kind = jax.devices()[0].device_kind.lower()
    except Exception:  # pragma: no cover - defensive
        return 1
    return 2 if "v7" in kind else 1


def _mse_kernel(a_ref, b_ref, out_ref, acc_ref, *, tm, rows, bpc,
                blocks_total, chunk, has_partial_edge, has_phantom):
    """Accumulate sum((a-b)^2) into an (8,128) vreg; reduce once at the end."""
    c = pl.program_id(0)                 # TensorCore shard
    i = pl.program_id(1)                 # streaming / reduction axis
    blk = c * bpc + i                    # unclamped logical block index

    @pl.when(i == 0)
    def _init():
        acc_ref[...] = jnp.zeros_like(acc_ref)

    def partial_sum(r0, nr, masked):
        # nr is a static Python int, multiple of the packed sublane tile.
        a = a_ref[pl.ds(r0, nr), :].astype(jnp.float32)
        b = b_ref[pl.ds(r0, nr), :].astype(jnp.float32)
        d = a - b
        d2 = d * d
        if masked:
            # Row-granular mask: (nr, 1) iota, broadcast only inside the select.
            row_ids = blk * tm + r0 + lax.broadcasted_iota(
                jnp.int32, (nr, 1), 0)
            d2 = jnp.where(row_ids < rows, d2, 0.0)
        # Pure-VPU fold of the nr/8 sublane tiles into the (8,128) accumulator.
        acc_ref[...] += jnp.sum(
            d2.reshape(nr // _SUBLANES, _SUBLANES, _LANES), axis=0)

    def accumulate(masked):
        n_full = tm // chunk
        if n_full > 0:
            def body(j, carry):
                partial_sum(pl.multiple_of(j * chunk, chunk), chunk, masked)
                return carry
            lax.fori_loop(0, n_full, body, 0,
                          unroll=True if n_full <= 8 else 4)
        rem_rows = tm % chunk
        if rem_rows:
            partial_sum(n_full * chunk, rem_rows, masked)

    if not (has_partial_edge or has_phantom):
        # Fast path: every block is full and real -> no mask, no gating.
        accumulate(masked=False)
    else:
        is_real = blk < blocks_total
        if has_partial_edge:
            is_edge = blk == (blocks_total - 1)

            @pl.when(jnp.logical_and(is_real, jnp.logical_not(is_edge)))
            def _interior():
                accumulate(masked=False)

            @pl.when(is_edge)
            def _edge():
                accumulate(masked=True)
        else:
            @pl.when(is_real)          # phantom blocks contribute nothing
            def _real():
                accumulate(masked=False)

    @pl.when(i == pl.num_programs(1) - 1)
    def _finalize():
        out_ref[...] = jnp.sum(acc_ref[...]).reshape(1, 1, 1)


def euler_distance(ec1, ec2):
    """MSE(ec1.float(), ec2.float()) with reduction='mean' (scalar f32)."""
    assert ec1.shape == ec2.shape, "EulerDistance expects matching shapes"
    n = int(ec1.size)
    if n == 0:
        # torch.nn.MSELoss(reduction='mean') on empty tensors is 0/0 -> nan.
        return jnp.float32(float("nan"))

    a = jnp.ravel(ec1)                   # contiguous reshape: no HBM copy
    b = jnp.ravel(ec2)

    a_item = jnp.dtype(a.dtype).itemsize
    b_item = jnp.dtype(b.dtype).itemsize
    # Packed-sublane factor: 1 for 32-bit, 2 for bf16/f16, 4 for int8/fp8.
    pack = max(1, 4 // a_item, 4 // b_item)
    align_rows = pack * _SUBLANES        # block rows must be a multiple of this
    align = align_rows * _LANES          # element alignment of the main slab

    rem = n % align
    n_main = n - rem

    tail_sum = jnp.float32(0.0)
    if rem:                              # < one packed vreg tile: plain JAX
        td = a[n_main:].astype(jnp.float32) - b[n_main:].astype(jnp.float32)
        tail_sum = jnp.sum(td * td)

    if n_main == 0:
        # Fewer elements than one packed vreg tile: no kernel launch needed.
        return tail_sum / jnp.float32(n)

    rows = n_main // _LANES              # multiple of align_rows
    a2 = a[:n_main].reshape(rows, _LANES)
    b2 = b[:n_main].reshape(rows, _LANES)

    # ~4 MiB per input per step, dtype-scaled, rounded to the packed tile.
    max_item = max(a_item, b_item)
    tm_target = _TARGET_BLOCK_BYTES // (_LANES * max_item)
    tm_target = max(align_rows, (tm_target // align_rows) * align_rows)
    tm = min(tm_target, rows)

    blocks_total = pl.cdiv(rows, tm)
    # Core split only when the chip has >1 TensorCore AND there is enough work.
    ncores = max(1, min(_tensorcores_per_device(), blocks_total))
    bpc = pl.cdiv(blocks_total, ncores)              # blocks per core
    has_phantom = (ncores * bpc) != blocks_total
    has_partial_edge = (rows % tm) != 0
    chunk = min(_CHUNK_ROWS, tm)

    if has_phantom:
        def in_map(c, i):
            # Clamp so phantom iterations never issue an OOB DMA; their
            # compute is skipped inside the kernel via pl.when.
            return (jnp.minimum(c * bpc + i, blocks_total - 1), 0)
    else:
        def in_map(c, i):
            return (c * bpc + i, 0)

    kernel = functools.partial(
        _mse_kernel, tm=tm, rows=rows, bpc=bpc, blocks_total=blocks_total,
        chunk=chunk, has_partial_edge=has_partial_edge,
        has_phantom=has_phantom)

    if ncores > 1:
        dim_sem = (pltpu.CORE_PARALLEL, pltpu.ARBITRARY)   # v7x dual-TC
    else:
        dim_sem = (pltpu.PARALLEL, pltpu.ARBITRARY)        # size-1 axis

    cost = pl.CostEstimate(
        flops=3 * n_main,
        transcendentals=0,
        bytes_accessed=n_main * (a_item + b_item) + ncores * 4,
    )

    partials = pl.pallas_call(
        kernel,
        out_shape=jax.ShapeDtypeStruct((ncores, 1, 1), jnp.float32),
        grid_spec=pltpu.PrefetchScalarGridSpec(
            num_scalar_prefetch=0,
            grid=(ncores, bpc),
            in_specs=[
                pl.BlockSpec((tm, _LANES), in_map),
                pl.BlockSpec((tm, _LANES), in_map),
            ],
            out_specs=pl.BlockSpec((1, 1, 1), lambda c, i: (c, 0, 0)),
            scratch_shapes=[pltpu.VMEM((_SUBLANES, _LANES), jnp.float32)],
        ),
        compiler_params=pltpu.CompilerParams(
            dimension_semantics=dim_sem,
            vmem_limit_bytes=_VMEM_LIMIT_BYTES,
        ),
        cost_estimate=cost,
    )(a2, b2)

    return (jnp.sum(partials) + tail_sum) / jnp.float32(n)


if __name__ == "__main__":
    key = jax.random.PRNGKey(0)
    k1, k2, k3, k4, k5, k6 = jax.random.split(key, 6)

    # Primary case: two (weighted) Euler characteristic transforms,
    # batch=2, channels=4, 16x16 spatial -> 2048 elements.
    shape = (2, 4, 16, 16)
    ec1 = jax.random.normal(k1, shape, dtype=jnp.float32)
    ec2 = jax.random.normal(k2, shape, dtype=jnp.float32)
    dist = jax.block_until_ready(euler_distance(ec1, ec2))
    ref = jnp.mean((ec1 - ec2) ** 2)
    assert jnp.allclose(dist, ref, rtol=1e-5, atol=1e-6), (dist, ref)

    # bf16 inputs stream at native width (no wrapper-side f32 copy in HBM).
    ec1_bf = ec1.astype(jnp.bfloat16)
    ec2_bf = ec2.astype(jnp.bfloat16)
    dist_bf = jax.block_until_ready(euler_distance(ec1_bf, ec2_bf))
    ref_bf = jnp.mean(
        (ec1_bf.astype(jnp.float32) - ec2_bf.astype(jnp.float32)) ** 2)
    assert jnp.allclose(dist_bf, ref_bf, rtol=1e-5, atol=1e-6), (dist_bf, ref_bf)

    # Non-(8*128)-aligned size: exercises the peeled-tail path.
    shape2 = (3, 5, 7, 11)               # 1155 elements
    ec3 = jax.random.normal(k3, shape2, dtype=jnp.float32)
    ec4 = jax.random.normal(k4, shape2, dtype=jnp.float32)
    dist2 = jax.block_until_ready(euler_distance(ec3, ec4))
    ref2 = jnp.mean((ec3 - ec4) ** 2)
    assert jnp.allclose(dist2, ref2, rtol=1e-5, atol=1e-6), (dist2, ref2)

    # Multi-block case with a partial edge block: exercises the gated row
    # mask, the chunked in-kernel loop and the multi-step pipeline.
    shape3 = (2, 600, 1024)              # 1,228,800 elements -> rows=9600 > tm
    ec5 = jax.random.normal(k5, shape3, dtype=jnp.float32)
    ec6 = jax.random.normal(k6, shape3, dtype=jnp.float32)
    dist3 = jax.block_until_ready(euler_distance(ec5, ec6))
    ref3 = jnp.mean((ec5 - ec6) ** 2)
    assert jnp.allclose(dist3, ref3, rtol=1e-4, atol=1e-6), (dist3, ref3)

    print("KERNEL_OK")
</pallas_src>

<mosaic_0001>
module attributes {stable_mosaic.version = 11 : i64} {
  func.func @_mse_kernel(%arg0: i32, %arg1: i32, %arg2: memref<16x128xf32, #tpu.memory_space<vmem>>, %arg3: memref<16x128xf32, #tpu.memory_space<vmem>>, %arg4: memref<1x1x1xf32, #tpu.memory_space<vmem>>, %arg5: memref<8x128xf32, #tpu.memory_space<vmem>>) attributes {dimension_semantics = [#tpu.dimension_semantics<parallel>, #tpu.dimension_semantics<arbitrary>], iteration_bounds = array<i64: 1, 1>, scalar_prefetch = 0 : i64, scratch_operands = 1 : i64, tpu.core_type = #tpu.core_type<tc>, window_params = [{transform_indices = @transform_0, window_bounds = array<i64: 16, 128>}, {transform_indices = @transform_1, window_bounds = array<i64: 16, 128>}, {transform_indices = @transform_2, window_bounds = array<i64: 1, 1, 1>}]} {
    %c0_i32 = arith.constant 0 : i32
    %0 = arith.cmpi eq, %arg1, %c0_i32 : i32
    %1 = arith.extui %0 : i1 to i32
    %c0_i32_0 = arith.constant 0 : i32
    %2 = arith.cmpi ne, %1, %c0_i32_0 : i32
    scf.if %2 {
      %cst_9 = arith.constant 0.000000e+00 : f32
      %19 = vector.broadcast %cst_9 : f32 to vector<8x128xf32>
      %c0_10 = arith.constant 0 : index
      %c0_11 = arith.constant 0 : index
      %20 = vector.load %arg5[%c0_10, %c0_11] : memref<8x128xf32, #tpu.memory_space<vmem>>, vector<8x128xf32>
      tpu.vector_store %arg5[%c0_10, %c0_11], %19 {strides = array<i32>} : memref<8x128xf32, #tpu.memory_space<vmem>>, vector<8x128xf32>,
    } else {
    }
    %c0_i32_1 = arith.constant 0 : i32
    %c16_i32 = arith.constant 16 : i32
    %3 = arith.muli %c0_i32_1, %c16_i32 : i32
    %4 = tpu.assume_multiple %3, 16 : i32
    %5 = arith.index_cast %4 : i32 to index
    %c0 = arith.constant 0 : index
    %6 = vector.load %arg2[%5, %c0] : memref<16x128xf32, #tpu.memory_space<vmem>>, vector<16x128xf32>
    %7 = arith.index_cast %4 : i32 to index
    %c0_2 = arith.constant 0 : index
    %8 = vector.load %arg3[%7, %c0_2] : memref<16x128xf32, #tpu.memory_space<vmem>>, vector<16x128xf32>
    %9 = arith.subf %6, %8 : vector<16x128xf32>
    %10 = arith.mulf %9, %9 : vector<16x128xf32>
    %c0_3 = arith.constant 0 : index
    %c0_4 = arith.constant 0 : index
    %11 = vector.load %arg5[%c0_3, %c0_4] : memref<8x128xf32, #tpu.memory_space<vmem>>, vector<8x128xf32>
    %12 = vector.shape_cast %10 : vector<16x128xf32> to vector<2x8x128xf32>
    %cst = arith.constant dense<0.000000e+00> : vector<8x128xf32>
    %13 = vector.multi_reduction <add>, %12, %cst [0] : vector<2x8x128xf32> to vector<8x128xf32>
    %14 = arith.addf %11, %13 : vector<8x128xf32>
    %c0_5 = arith.constant 0 : index
    %c0_6 = arith.constant 0 : index
    %15 = vector.load %arg5[%c0_5, %c0_6] : memref<8x128xf32, #tpu.memory_space<vmem>>, vector<8x128xf32>
    tpu.vector_store %arg5[%c0_5, %c0_6], %14 {strides = array<i32>} : memref<8x128xf32, #tpu.memory_space<vmem>>, vector<8x128xf32>,
    %c1_i32 = arith.constant 1 : i32
    %c0_i32_7 = arith.constant 0 : i32
    %16 = arith.cmpi eq, %arg1, %c0_i32_7 : i32
    %17 = arith.extui %16 : i1 to i32
    %c0_i32_8 = arith.constant 0 : i32
    %18 = arith.cmpi ne, %17, %c0_i32_8 : i32
    scf.if %18 {
      %c0_9 = arith.constant 0 : index
      %c0_10 = arith.constant 0 : index
      %19 = vector.load %arg5[%c0_9, %c0_10] : memref<8x128xf32, #tpu.memory_space<vmem>>, vector<8x128xf32>
      %20 = vector.shape_cast %19 : vector<8x128xf32> to vector<1x8x128xf32>
      %cst_11 = arith.constant dense<0.000000e+00> : vector<1xf32>
      %21 = vector.multi_reduction <add>, %20, %cst_11 [1, 2] : vector<1x8x128xf32> to vector<1xf32>
      %22 = vector.shape_cast %21 : vector<1xf32> to vector<1x1x1xf32>
      %23 = vector.extract %22[0, 0, 0] : f32 from vector<1x1x1xf32>
      %24 = vector.broadcast %23 : f32 to vector<1x1x1xf32>
      %c0_12 = arith.constant 0 : index
      %c0_13 = arith.constant 0 : index
      %c0_14 = arith.constant 0 : index
      %25 = vector.load %arg4[%c0_12, %c0_13, %c0_14] : memref<1x1x1xf32, #tpu.memory_space<vmem>>, vector<1x1x1xf32>
      tpu.vector_store %arg4[%c0_12, %c0_13, %c0_14], %24 {strides = array<i32>} : memref<1x1x1xf32, #tpu.memory_space<vmem>>, vector<1x1x1xf32>,
    } else {
    }
    return
  }
  func.func @transform_0(%arg0: i32, %arg1: i32) -> (i32, i32) {
    %c1_i32 = arith.constant 1 : i32
    %0 = arith.muli %arg0, %c1_i32 : i32
    %1 = arith.addi %0, %arg1 : i32
    %c0_i32 = arith.constant 0 : i32
    %c0_i32_0 = arith.constant 0 : i32
    return %1, %c0_i32 : i32, i32
  }
  func.func @transform_1(%arg0: i32, %arg1: i32) -> (i32, i32) {
    %c1_i32 = arith.constant 1 : i32
    %0 = arith.muli %arg0, %c1_i32 : i32
    %1 = arith.addi %0, %arg1 : i32
    %c0_i32 = arith.constant 0 : i32
    %c0_i32_0 = arith.constant 0 : i32
    return %1, %c0_i32 : i32, i32
  }
  func.func @transform_2(%arg0: i32, %arg1: i32) -> (i32, i32, i32) {
    %c0_i32 = arith.constant 0 : i32
    %c0_i32_0 = arith.constant 0 : i32
    %c0_i32_1 = arith.constant 0 : i32
    return %arg0, %c0_i32, %c0_i32_0 : i32, i32, i32
  }
}

</mosaic_0001>

<bundles_post_ra>
// kernel: tpu_custom_call.1
= control target key start
LH: loop header
LB: loop body
LE: loop exit
PB: predicated region body
PF: predicated region fallthrough
CT: control target
= control target key end

     0   :  { %7 = vsyncpa [#allocation4], 0  ;;  %s221_s0 = inlined_call_operand.hbm [shape: f32[16,128], index: 0, kind: input, shape index: {}]   ;;  %s222_s1 = inlined_call_operand.hbm [shape: f32[16,128], index: 1, kind: input, shape index: {}]   ;;  %s223_s2 = inlined_call_operand.hbm [shape: f32[1,1,1], index: 2, kind: output, shape index: {}]  }
   0x1   :  { %8 = vsyncpa [#allocation7], 0 }
   0x2   :  { %9 = vsyncpa [#allocation5], 0  ;;  %s18_s11 = sshll.u32 %s221_s0, 4  ;;  %s192_s12 = smov [#allocation3]   ;;  %s19_s11 = int_to_ptr.hbm [resolvable:$true] %s18_s11 }
   0x3   :  { %s20_s13 = sshll.u32 %s192_s12, 4  ;;  %s35_s16 = sshll.u32 %s222_s1, 4  ;;  %s21_s13 = int_to_ptr.vmem [resolvable:$true] %s20_s13  ;;  %s36_s16 = int_to_ptr.hbm [resolvable:$true] %s35_s16 }
   0x4   :  { %s193_s17 = smov 128   ;;  %s194_s18 = smov 8  }
   0x5   :  { %26 = dma.hbm_to_vmem [thread:$0]  %s19_s11, 256, %s21_s13, [#allocation4], %s193_s17, %s193_s17, %s194_s18  }
   0x6   :  { %s195_s19 = smov [#allocation6]  }
   0x7   :  { %s37_s20 = sshll.u32 %s195_s19, 4  ;;  %s38_s20 = int_to_ptr.vmem [resolvable:$true] %s37_s20 }
   0x8   :  { %43 = dma.hbm_to_vmem [thread:$0]  %s36_s16, 256, %s38_s20, [#allocation7], %s193_s17, %s193_s17, %s194_s18  }
   0x9   :  { %186 = dma.done.wait [#allocation4], 256  }
   0xa   :  { %187 = vsyncadd [#allocation4], 4294967040 }
   0xb   :  { %188 = dma.done.wait [#allocation7], 256  }
   0xc   :  { %189 = vsyncadd [#allocation7], 4294967040  ;;  %v61_v0 = vld [vmem:[#allocation3] sm:$0xff]  ;;  %v62_v1 = vld [vmem:[#allocation3 + $0x8] sm:$0xff]  ;;  %s196_s0 = smov [#allocation8]   ;;  %s96_s23 = sshll.u32 %s223_s2, 4  ;;  %s97_s23 = int_to_ptr.hbm [resolvable:$true] %s96_s23 }
   0xd   :  { %v63_v2 = vld [vmem:[#allocation6] sm:$0xff]  ;;  %v64_v3 = vld [vmem:[#allocation6 + $0x8] sm:$0xff]  ;;  %s94_s1 = sshll.u32 %s196_s0, 4  ;;  %vm87_vm0 = vcmask 0   ;;  %s95_s1 = int_to_ptr.vmem [resolvable:$true] %s94_s1 }
   0xe   :  { %v65_v4 = vsub.f32 %v61_v0, %v63_v2  ;;  %v66_v5 = vsub.f32 %v62_v1, %v64_v3 }
  0x10   :  { %v67_v6 = vmul.f32 %v65_v4, %v65_v4  ;;  %v68_v7 = vmul.f32 %v66_v5, %v66_v5 }
  0x12   :  { %v70_v8 = vadd.f32 %v68_v7, %v67_v6 }
  0x14   :  { %77 = vadd.xlane.f32.xlu0 %v70_v8 }
  0x87   :  { %v78_v9 = vpop.xlane.xlu0 %77 }
  0x88   :  { %v79_v10 = vrot.slane %v78_v9, 4 }
  0x8a   :  { %v80_v11 = vadd.f32 %v79_v10, %v78_v9 }
  0x8c   :  { %v81_v12 = vrot.slane %v80_v11, 2 }
  0x8e   :  { %v82_v13 = vadd.f32 %v81_v12, %v80_v11 }
  0x90   :  { %v83_v14 = vrot.slane %v82_v13, 1 }
  0x92   :  { %v84_v15 = vadd.f32 %v83_v14, %v82_v13 }
  0x94   :  { %107 = vpush %v84_v15 }
  0xc5   :  { %s108_s24 = spop %107 }
  0xc6   :  { %v86_v16 = vstv %s108_s24 }
  0xc7   :  { %88 = vst.msk [vmem:[#allocation8] sm:$0x1] %vm87_vm0, %v86_v16 }
  0xc8   :  { %99 = dma.vmem_to_hbm [thread:$0]  %s95_s1, 16, %s97_s23, [#allocation5]  }
  0xc9   :  { %190 = dma.done.wait [#allocation5], 16  }
  0xca   :  { %191 = vsyncadd [#allocation5], 4294967280 }
  0xcb   :  { %104 = vsyncpa [#allocation4], 1 }
  0xcc   :  { %105 = vsyncpa [#allocation7], 1 }
  0xcd   :  { %106 = vsyncpa [#allocation5], 1 }

</bundles_post_ra>
